<compile_context>
chip_gen: v6e
topology: v6e:2x2x1
jax: 0.10.0
libtpu: 0.0.40
codegen_flags: <defaults>
</compile_context>

<pallas_src>
import math

import jax
import jax.numpy as jnp
from jax import lax
from jax.experimental import pallas as pl
from jax.experimental.pallas import tpu as pltpu

# ---- model dims (small, consistent with the module) -------------------------
B = 2        # batch
S = 8        # sequence length
D = 32       # encoder.hidden_dim
H = 4        # encoder.num_heads
DH = D // H  # head dim
EPS = 1e-5


def _layernorm(x, gamma, beta):
    mu = jnp.mean(x, axis=-1, keepdims=True)
    var = jnp.mean((x - mu) * (x - mu), axis=-1, keepdims=True)
    return (x - mu) * lax.rsqrt(var + EPS) * gamma + beta


def _gelu_exact(x):
    # PyTorch nn.GELU() default: exact erf formulation.
    return 0.5 * x * (1.0 + lax.erf(x * (1.0 / math.sqrt(2.0))))


def encoder_block_kernel(
    x_ref,                    # (B*S, D) f32 activations
    g1_ref, bt1_ref,          # (1, D) f32  LayerNorm1 gamma/beta
    wqkv_ref,                 # (D, 3D) bf16 fused QKV weight, columns (h, qkv, dh),
                              #              q columns pre-scaled by 1/sqrt(DH)
    wo_ref,                   # (D, D) bf16 out-projection weight (in, out)
    g2_ref, bt2_ref,          # (1, D) f32  LayerNorm2 gamma/beta
    w1_ref, b1_ref,           # (D, 4D) bf16, (1, 4D) f32
    w2_ref, b2_ref,           # (4D, D) bf16, (1, D) f32
    o_ref,                    # (B*S, D)
):
    f32 = jnp.float32
    bf16 = jnp.bfloat16

    x = x_ref[...].astype(f32)                        # (16, 32)
    x_res = x

    # ---- LN1 ----
    h1 = _layernorm(x, g1_ref[0], bt1_ref[0])

    # ---- fused Q/K/V projection: ONE MXU push on the full slab ----
    # TODO(synk): optional attn_mask path of forward() not implemented (attn_mask=None only).
    qkv = jnp.dot(h1.astype(bf16), wqkv_ref[...],
                  preferred_element_type=f32)         # (16, 96), cols (h, qkv, dh)

    # ---- relayout to head-batched tiles: static slices + leading-axis stack ----
    tiles = []
    for b in range(B):                                # trace-time unrolled (2x4 = 8 tiles)
        for h in range(H):
            tiles.append(qkv[b * S:(b + 1) * S,
                             h * 3 * DH:(h + 1) * 3 * DH])    # (S, 3*DH)
    qkv_h = jnp.stack(tiles, axis=0)                  # (B*H, S, 3*DH) f32
    q = qkv_h[:, :, 0 * DH:1 * DH].astype(bf16)       # (B*H, S, DH), scale pre-folded
    k = qkv_h[:, :, 1 * DH:2 * DH].astype(bf16)
    v = qkv_h[:, :, 2 * DH:3 * DH].astype(bf16)

    # ---- attention scores + softmax, batched over all (b, h) pairs ----
    s = jnp.einsum("nsd,ntd->nst", q, k, preferred_element_type=f32)   # (B*H, S, S)
    s = s - jnp.max(s, axis=-1, keepdims=True)
    p = jnp.exp(s)
    p = p * pl.reciprocal(jnp.sum(p, axis=-1, keepdims=True), approx=True)

    o_h = jnp.einsum("nst,ntd->nsd", p.astype(bf16), v,
                     preferred_element_type=f32)                       # (B*H, S, DH)

    # ---- concat heads back to (B*S, D) rows; ONE K=32 out-projection matmul ----
    rows = []
    for b in range(B):
        rows.append(jnp.concatenate([o_h[b * H + h] for h in range(H)], axis=-1))  # (S, D)
    o_cat = jnp.concatenate(rows, axis=0)                              # (16, 32)
    attn_out = jnp.dot(o_cat.astype(bf16), wo_ref[...],
                       preferred_element_type=f32)                     # (16, 32)

    # ---- residual 1 ----
    x2 = attn_out + x_res

    # ---- LN2 + feed-forward (Linear -> GELU -> Linear) + residual ----
    h2 = _layernorm(x2, g2_ref[0], bt2_ref[0])
    f1 = jnp.dot(h2.astype(bf16), w1_ref[...], preferred_element_type=f32) + b1_ref[0]
    f1 = _gelu_exact(f1)
    f2 = jnp.dot(f1.astype(bf16), w2_ref[...], preferred_element_type=f32) + b2_ref[0]

    o_ref[...] = (x2 + f2).astype(o_ref.dtype)


def encoder_block(x, kparams):
    """x: (B, S, D) f32; kparams from prepare_kernel_params()."""
    (g1, bt1, wqkv, wo, g2, bt2, w1_t, b1, w2_t, b2) = kparams
    N = B * S
    x2d = x.reshape(N, D)                 # free XLA-level reshape

    # Single invocation, no grid: whole problem fits in a few KB of VMEM on
    # v5e/v6e/v7x alike, and a grid would only add per-step overhead.
    vmem = pl.BlockSpec(memory_space=pltpu.MemorySpace.VMEM)

    out = pl.pallas_call(
        encoder_block_kernel,
        out_shape=jax.ShapeDtypeStruct((N, D), x.dtype),
        in_specs=[vmem] * 11,
        out_specs=vmem,
    )(x2d, g1, bt1, wqkv, wo, g2, bt2, w1_t, b1, w2_t, b2)
    return out.reshape(B, S, D)


# ---------------------------- parameters & reference -------------------------
def make_params(key):
    """PyTorch-layout f32 parameters (Linear weights are (out, in))."""
    ks = jax.random.split(key, 10)
    init = lambda k, shape, fan_in: (jax.random.normal(k, shape, jnp.float32)
                                     / math.sqrt(fan_in))
    w_qkv = init(ks[0], (3 * D, D), D)
    w_out = init(ks[1], (D, D), D)
    w1 = init(ks[2], (4 * D, D), D)
    b1 = 0.02 * jax.random.normal(ks[3], (4 * D,), jnp.float32)
    w2 = init(ks[4], (D, 4 * D), 4 * D)
    b2 = 0.02 * jax.random.normal(ks[5], (D,), jnp.float32)
    g1 = 1.0 + 0.05 * jax.random.normal(ks[6], (D,), jnp.float32)
    bt1 = 0.05 * jax.random.normal(ks[7], (D,), jnp.float32)
    g2 = 1.0 + 0.05 * jax.random.normal(ks[8], (D,), jnp.float32)
    bt2 = 0.05 * jax.random.normal(ks[9], (D,), jnp.float32)
    return (w_qkv, w_out, w1, b1, w2, b2, g1, bt1, g2, bt2)


def prepare_kernel_params(tp):
    """Kernel layout: (in, out) matmul weights in bf16.

    The QKV weight is fused into one (D, 3D) matrix with columns reordered
    head-major -> (h, qkv, dh) so each head's q|k|v block is lane-contiguous,
    and the 1/sqrt(DH) attention scale is folded into the q columns.
    """
    (w_qkv, w_out, w1, b1, w2, b2, g1, bt1, g2, bt2) = tp
    bf = jnp.bfloat16
    scale = 1.0 / math.sqrt(DH)

    wqkv_t = w_qkv.T                                                  # (D, 3D), cols (qkv, h, dh)
    col_scale = jnp.concatenate([jnp.full((D,), scale, jnp.float32),
                                 jnp.ones((2 * D,), jnp.float32)])
    wqkv_scaled = wqkv_t * col_scale[None, :]                         # fold attn scale into q
    wqkv_fused = (wqkv_scaled.reshape(D, 3, H, DH)
                  .transpose(0, 2, 1, 3)                              # cols -> (h, qkv, dh)
                  .reshape(D, 3 * D)).astype(bf)

    wo_t = w_out.T.astype(bf)                                         # (D, D), rows (h, dh)
    w1_t = w1.T.astype(bf)                                            # (D, 4D)
    w2_t = w2.T.astype(bf)                                            # (4D, D)
    row = lambda v: v.reshape(1, -1).astype(jnp.float32)
    return (row(g1), row(bt1), wqkv_fused, wo_t,
            row(g2), row(bt2), w1_t, row(b1), w2_t, row(b2))


def reference(x, tp, matmul_dtype=jnp.float32, fold_scale=False):
    """Pure-JAX reference mirroring the PyTorch forward (attn_mask=None).

    matmul_dtype=bf16 + fold_scale=True mirrors the kernel's bf16 MXU operands
    (f32 accumulation) and its scale-folded q weights.
    """
    (w_qkv, w_out, w1, b1, w2, b2, g1, bt1, g2, bt2) = tp
    scale = 1.0 / math.sqrt(DH)
    if fold_scale:
        w_qkv = jnp.concatenate([w_qkv[:D] * scale, w_qkv[D:]], axis=0)
        post_scale = 1.0
    else:
        post_scale = scale
    cast = lambda a: a.astype(matmul_dtype)
    f32 = jnp.float32
    x = x.astype(f32)
    x_res = x
    h = _layernorm(x, g1, bt1)
    qkv = jnp.einsum("bsd,ed->bse", cast(h), cast(w_qkv), preferred_element_type=f32)
    q, k, v = qkv[..., :D], qkv[..., D:2 * D], qkv[..., 2 * D:]
    heads = lambda t: t.reshape(B, S, H, DH).transpose(0, 2, 1, 3)    # (B, H, S, DH)
    q, k, v = heads(q), heads(k), heads(v)
    s = jnp.einsum("bhsd,bhtd->bhst", cast(q), cast(k),
                   preferred_element_type=f32) * post_scale
    p = jax.nn.softmax(s, axis=-1)
    a = jnp.einsum("bhst,bhtd->bhsd", cast(p), cast(v), preferred_element_type=f32)
    a = a.transpose(0, 2, 1, 3).reshape(B, S, D)
    x2 = jnp.einsum("bsd,ed->bse", cast(a), cast(w_out), preferred_element_type=f32) + x_res
    h2 = _layernorm(x2, g2, bt2)
    f1 = _gelu_exact(jnp.einsum("bsd,ed->bse", cast(h2), cast(w1),
                                preferred_element_type=f32) + b1)
    f2 = jnp.einsum("bsd,ed->bse", cast(f1), cast(w2), preferred_element_type=f32) + b2
    return x2 + f2


if __name__ == "__main__":
    key = jax.random.PRNGKey(0)
    kx, kp = jax.random.split(key)
    x = jax.random.normal(kx, (B, S, D), jnp.float32)
    torch_params = make_params(kp)
    kparams = prepare_kernel_params(torch_params)

    out = jax.block_until_ready(encoder_block(x, kparams))
    assert out.shape == (B, S, D)

    # Tight check vs a reference mirroring the kernel's bf16 MXU operands and
    # folded attention scale, plus a looser sanity bound vs the pure-f32
    # PyTorch-semantics reference (bf16 rounding dominates that gap).
    ref_bf16 = reference(x, torch_params, matmul_dtype=jnp.bfloat16, fold_scale=True)
    ref_f32 = reference(x, torch_params, matmul_dtype=jnp.float32)
    err_b = float(jnp.max(jnp.abs(out - ref_bf16)))
    err_f = float(jnp.max(jnp.abs(out - ref_f32)))
    assert jnp.allclose(out, ref_bf16, atol=1e-2, rtol=1e-2), err_b
    assert jnp.allclose(out, ref_f32, atol=6e-2, rtol=6e-2), err_f

    print("KERNEL_OK")
</pallas_src>

<mosaic_0001>
module attributes {stable_mosaic.version = 11 : i64} {
  func.func @encoder_block_kernel(%arg0: memref<16x32xf32, #tpu.memory_space<vmem>>, %arg1: memref<1x32xf32, #tpu.memory_space<vmem>>, %arg2: memref<1x32xf32, #tpu.memory_space<vmem>>, %arg3: memref<32x96xbf16, #tpu.memory_space<vmem>>, %arg4: memref<32x32xbf16, #tpu.memory_space<vmem>>, %arg5: memref<1x32xf32, #tpu.memory_space<vmem>>, %arg6: memref<1x32xf32, #tpu.memory_space<vmem>>, %arg7: memref<32x128xbf16, #tpu.memory_space<vmem>>, %arg8: memref<1x128xf32, #tpu.memory_space<vmem>>, %arg9: memref<128x32xbf16, #tpu.memory_space<vmem>>, %arg10: memref<1x32xf32, #tpu.memory_space<vmem>>, %arg11: memref<16x32xf32, #tpu.memory_space<vmem>>) attributes {dimension_semantics = [], scalar_prefetch = 0 : i64, scratch_operands = 0 : i64, tpu.core_type = #tpu.core_type<tc>} {
    %c0 = arith.constant 0 : index
    %c0_0 = arith.constant 0 : index
    %0 = vector.load %arg0[%c0, %c0_0] : memref<16x32xf32, #tpu.memory_space<vmem>>, vector<16x32xf32>
    %c0_1 = arith.constant 0 : index
    %c0_2 = arith.constant 0 : index
    %1 = vector.load %arg1[%c0_1, %c0_2] : memref<1x32xf32, #tpu.memory_space<vmem>>, vector<1x32xf32>
    %2 = vector.shape_cast %1 : vector<1x32xf32> to vector<32xf32>
    %c0_3 = arith.constant 0 : index
    %c0_4 = arith.constant 0 : index
    %3 = vector.load %arg2[%c0_3, %c0_4] : memref<1x32xf32, #tpu.memory_space<vmem>>, vector<1x32xf32>
    %4 = vector.shape_cast %3 : vector<1x32xf32> to vector<32xf32>
    %cst = arith.constant dense<0.000000e+00> : vector<16xf32>
    %5 = vector.multi_reduction <add>, %0, %cst [1] : vector<16x32xf32> to vector<16xf32>
    %6 = vector.shape_cast %5 : vector<16xf32> to vector<16x1xf32>
    %cst_5 = arith.constant 3.200000e+01 : f32
    %7 = vector.broadcast %cst_5 : f32 to vector<16x1xf32>
    %8 = arith.divf %6, %7 : vector<16x1xf32>
    %9 = vector.broadcast %8 : vector<16x1xf32> to vector<16x32xf32>
    %10 = arith.subf %0, %9 : vector<16x32xf32>
    %11 = vector.broadcast %8 : vector<16x1xf32> to vector<16x32xf32>
    %12 = arith.subf %0, %11 : vector<16x32xf32>
    %13 = arith.mulf %10, %12 : vector<16x32xf32>
    %cst_6 = arith.constant dense<0.000000e+00> : vector<16xf32>
    %14 = vector.multi_reduction <add>, %13, %cst_6 [1] : vector<16x32xf32> to vector<16xf32>
    %15 = vector.shape_cast %14 : vector<16xf32> to vector<16x1xf32>
    %cst_7 = arith.constant 3.200000e+01 : f32
    %16 = vector.broadcast %cst_7 : f32 to vector<16x1xf32>
    %17 = arith.divf %15, %16 : vector<16x1xf32>
    %18 = vector.broadcast %8 : vector<16x1xf32> to vector<16x32xf32>
    %19 = arith.subf %0, %18 : vector<16x32xf32>
    %cst_8 = arith.constant 9.99999974E-6 : f32
    %20 = vector.broadcast %cst_8 : f32 to vector<16x1xf32>
    %21 = arith.addf %17, %20 : vector<16x1xf32>
    %22 = math.rsqrt %21 : vector<16x1xf32>
    %23 = vector.broadcast %22 : vector<16x1xf32> to vector<16x32xf32>
    %24 = arith.mulf %19, %23 : vector<16x32xf32>
    %25 = vector.shape_cast %2 : vector<32xf32> to vector<1x32xf32>
    %26 = vector.broadcast %25 : vector<1x32xf32> to vector<16x32xf32>
    %27 = arith.mulf %24, %26 : vector<16x32xf32>
    %28 = vector.shape_cast %4 : vector<32xf32> to vector<1x32xf32>
    %29 = vector.broadcast %28 : vector<1x32xf32> to vector<16x32xf32>
    %30 = arith.addf %27, %29 : vector<16x32xf32>
    %31 = arith.truncf %30 : vector<16x32xf32> to vector<16x32xbf16>
    %c0_9 = arith.constant 0 : index
    %c0_10 = arith.constant 0 : index
    %32 = vector.load %arg3[%c0_9, %c0_10] : memref<32x96xbf16, #tpu.memory_space<vmem>>, vector<32x96xbf16>
    %cst_11 = arith.constant dense<0.000000e+00> : vector<16x96xf32>
    %33 = tpu.matmul %31, %32, %cst_11 {dimension_numbers = #tpu.dot_dimension_numbers<[1], [0], [0], [1], [0, 0, 1, 1], [], []>} : vector<16x32xbf16>, vector<32x96xbf16>, vector<16x96xf32> -> vector<16x96xf32>
    %34 = vector.extract_strided_slice %33 {offsets = [0, 0], sizes = [8, 24], strides = [1, 1]} : vector<16x96xf32> to vector<8x24xf32>
    %35 = vector.extract_strided_slice %33 {offsets = [0, 24], sizes = [8, 24], strides = [1, 1]} : vector<16x96xf32> to vector<8x24xf32>
    %36 = vector.extract_strided_slice %33 {offsets = [0, 48], sizes = [8, 24], strides = [1, 1]} : vector<16x96xf32> to vector<8x24xf32>
    %37 = vector.extract_strided_slice %33 {offsets = [0, 72], sizes = [8, 24], strides = [1, 1]} : vector<16x96xf32> to vector<8x24xf32>
    %38 = vector.extract_strided_slice %33 {offsets = [8, 0], sizes = [8, 24], strides = [1, 1]} : vector<16x96xf32> to vector<8x24xf32>
    %39 = vector.extract_strided_slice %33 {offsets = [8, 24], sizes = [8, 24], strides = [1, 1]} : vector<16x96xf32> to vector<8x24xf32>
    %40 = vector.extract_strided_slice %33 {offsets = [8, 48], sizes = [8, 24], strides = [1, 1]} : vector<16x96xf32> to vector<8x24xf32>
    %41 = vector.extract_strided_slice %33 {offsets = [8, 72], sizes = [8, 24], strides = [1, 1]} : vector<16x96xf32> to vector<8x24xf32>
    %42 = vector.shape_cast %34 : vector<8x24xf32> to vector<1x8x24xf32>
    %43 = vector.shape_cast %35 : vector<8x24xf32> to vector<1x8x24xf32>
    %44 = vector.shape_cast %36 : vector<8x24xf32> to vector<1x8x24xf32>
    %45 = vector.shape_cast %37 : vector<8x24xf32> to vector<1x8x24xf32>
    %46 = vector.shape_cast %38 : vector<8x24xf32> to vector<1x8x24xf32>
    %47 = vector.shape_cast %39 : vector<8x24xf32> to vector<1x8x24xf32>
    %48 = vector.shape_cast %40 : vector<8x24xf32> to vector<1x8x24xf32>
    %49 = vector.shape_cast %41 : vector<8x24xf32> to vector<1x8x24xf32>
    %50 = tpu.concatenate %42, %43, %44, %45, %46, %47, %48, %49 in 0 : vector<1x8x24xf32>, vector<1x8x24xf32>, vector<1x8x24xf32>, vector<1x8x24xf32>, vector<1x8x24xf32>, vector<1x8x24xf32>, vector<1x8x24xf32>, vector<1x8x24xf32> -> vector<8x8x24xf32>
    %51 = vector.extract_strided_slice %50 {offsets = [0, 0, 0], sizes = [8, 8, 8], strides = [1, 1, 1]} : vector<8x8x24xf32> to vector<8x8x8xf32>
    %52 = arith.truncf %51 : vector<8x8x8xf32> to vector<8x8x8xbf16>
    %53 = vector.extract_strided_slice %50 {offsets = [0, 0, 8], sizes = [8, 8, 8], strides = [1, 1, 1]} : vector<8x8x24xf32> to vector<8x8x8xf32>
    %54 = arith.truncf %53 : vector<8x8x8xf32> to vector<8x8x8xbf16>
    %55 = vector.extract_strided_slice %50 {offsets = [0, 0, 16], sizes = [8, 8, 8], strides = [1, 1, 1]} : vector<8x8x24xf32> to vector<8x8x8xf32>
    %56 = arith.truncf %55 : vector<8x8x8xf32> to vector<8x8x8xbf16>
    "tpu.trace_start"() <{level = 10 : i32, message = "nsd,ntd->nst"}> : () -> ()
    %cst_12 = arith.constant dense<0.000000e+00> : vector<8x8x8xf32>
    %57 = tpu.matmul %52, %54, %cst_12 {dimension_numbers = #tpu.dot_dimension_numbers<[2], [2], [1], [1], [0, 0, 0, 1, 1, 1], [0], [0]>} : vector<8x8x8xbf16>, vector<8x8x8xbf16>, vector<8x8x8xf32> -> vector<8x8x8xf32>
    "tpu.trace_stop"() : () -> ()
    %cst_13 = arith.constant dense<0xFF800000> : vector<8x8xf32>
    %58 = vector.multi_reduction <maximumf>, %57, %cst_13 [2] : vector<8x8x8xf32> to vector<8x8xf32>
    %59 = vector.shape_cast %58 : vector<8x8xf32> to vector<8x8x1xf32>
    %60 = vector.broadcast %59 : vector<8x8x1xf32> to vector<8x8x8xf32>
    %61 = arith.subf %57, %60 : vector<8x8x8xf32>
    %62 = math.exp %61 : vector<8x8x8xf32>
    %cst_14 = arith.constant dense<0.000000e+00> : vector<8x8xf32>
    %63 = vector.multi_reduction <add>, %62, %cst_14 [2] : vector<8x8x8xf32> to vector<8x8xf32>
    %64 = vector.shape_cast %63 : vector<8x8xf32> to vector<8x8x1xf32>
    %65 = tpu.reciprocal %64 {approx = true} : vector<8x8x1xf32> -> vector<8x8x1xf32>
    %66 = vector.broadcast %65 : vector<8x8x1xf32> to vector<8x8x8xf32>
    %67 = arith.mulf %62, %66 : vector<8x8x8xf32>
    %68 = arith.truncf %67 : vector<8x8x8xf32> to vector<8x8x8xbf16>
    "tpu.trace_start"() <{level = 10 : i32, message = "nst,ntd->nsd"}> : () -> ()
    %cst_15 = arith.constant dense<0.000000e+00> : vector<8x8x8xf32>
    %69 = tpu.matmul %68, %56, %cst_15 {dimension_numbers = #tpu.dot_dimension_numbers<[2], [1], [1], [2], [0, 0, 0, 1, 1, 2], [0], [0]>} : vector<8x8x8xbf16>, vector<8x8x8xbf16>, vector<8x8x8xf32> -> vector<8x8x8xf32>
    "tpu.trace_stop"() : () -> ()
    %70 = vector.extract_strided_slice %69 {offsets = [0, 0, 0], sizes = [1, 8, 8], strides = [1, 1, 1]} : vector<8x8x8xf32> to vector<1x8x8xf32>
    %71 = vector.shape_cast %70 : vector<1x8x8xf32> to vector<8x8xf32>
    %72 = vector.extract_strided_slice %69 {offsets = [1, 0, 0], sizes = [1, 8, 8], strides = [1, 1, 1]} : vector<8x8x8xf32> to vector<1x8x8xf32>
    %73 = vector.shape_cast %72 : vector<1x8x8xf32> to vector<8x8xf32>
    %74 = vector.extract_strided_slice %69 {offsets = [2, 0, 0], sizes = [1, 8, 8], strides = [1, 1, 1]} : vector<8x8x8xf32> to vector<1x8x8xf32>
    %75 = vector.shape_cast %74 : vector<1x8x8xf32> to vector<8x8xf32>
    %76 = vector.extract_strided_slice %69 {offsets = [3, 0, 0], sizes = [1, 8, 8], strides = [1, 1, 1]} : vector<8x8x8xf32> to vector<1x8x8xf32>
    %77 = vector.shape_cast %76 : vector<1x8x8xf32> to vector<8x8xf32>
    %78 = tpu.concatenate %71, %73, %75, %77 in 1 : vector<8x8xf32>, vector<8x8xf32>, vector<8x8xf32>, vector<8x8xf32> -> vector<8x32xf32>
    %79 = vector.extract_strided_slice %69 {offsets = [4, 0, 0], sizes = [1, 8, 8], strides = [1, 1, 1]} : vector<8x8x8xf32> to vector<1x8x8xf32>
    %80 = vector.shape_cast %79 : vector<1x8x8xf32> to vector<8x8xf32>
    %81 = vector.extract_strided_slice %69 {offsets = [5, 0, 0], sizes = [1, 8, 8], strides = [1, 1, 1]} : vector<8x8x8xf32> to vector<1x8x8xf32>
    %82 = vector.shape_cast %81 : vector<1x8x8xf32> to vector<8x8xf32>
    %83 = vector.extract_strided_slice %69 {offsets = [6, 0, 0], sizes = [1, 8, 8], strides = [1, 1, 1]} : vector<8x8x8xf32> to vector<1x8x8xf32>
    %84 = vector.shape_cast %83 : vector<1x8x8xf32> to vector<8x8xf32>
    %85 = vector.extract_strided_slice %69 {offsets = [7, 0, 0], sizes = [1, 8, 8], strides = [1, 1, 1]} : vector<8x8x8xf32> to vector<1x8x8xf32>
    %86 = vector.shape_cast %85 : vector<1x8x8xf32> to vector<8x8xf32>
    %87 = tpu.concatenate %80, %82, %84, %86 in 1 : vector<8x8xf32>, vector<8x8xf32>, vector<8x8xf32>, vector<8x8xf32> -> vector<8x32xf32>
    %88 = tpu.concatenate %78, %87 in 0 : vector<8x32xf32>, vector<8x32xf32> -> vector<16x32xf32>
    %89 = arith.truncf %88 : vector<16x32xf32> to vector<16x32xbf16>
    %c0_16 = arith.constant 0 : index
    %c0_17 = arith.constant 0 : index
    %90 = vector.load %arg4[%c0_16, %c0_17] : memref<32x32xbf16, #tpu.memory_space<vmem>>, vector<32x32xbf16>
    %cst_18 = arith.constant dense<0.000000e+00> : vector<16x32xf32>
    %91 = tpu.matmul %89, %90, %cst_18 {dimension_numbers = #tpu.dot_dimension_numbers<[1], [0], [0], [1], [0, 0, 1, 1], [], []>} : vector<16x32xbf16>, vector<32x32xbf16>, vector<16x32xf32> -> vector<16x32xf32>
    %92 = arith.addf %91, %0 : vector<16x32xf32>
    %c0_19 = arith.constant 0 : index
    %c0_20 = arith.constant 0 : index
    %93 = vector.load %arg5[%c0_19, %c0_20] : memref<1x32xf32, #tpu.memory_space<vmem>>, vector<1x32xf32>
    %94 = vector.shape_cast %93 : vector<1x32xf32> to vector<32xf32>
    %c0_21 = arith.constant 0 : index
    %c0_22 = arith.constant 0 : index
    %95 = vector.load %arg6[%c0_21, %c0_22] : memref<1x32xf32, #tpu.memory_space<vmem>>, vector<1x32xf32>
    %96 = vector.shape_cast %95 : vector<1x32xf32> to vector<32xf32>
    %cst_23 = arith.constant dense<0.000000e+00> : vector<16xf32>
    %97 = vector.multi_reduction <add>, %92, %cst_23 [1] : vector<16x32xf32> to vector<16xf32>
    %98 = vector.shape_cast %97 : vector<16xf32> to vector<16x1xf32>
    %cst_24 = arith.constant 3.200000e+01 : f32
    %99 = vector.broadcast %cst_24 : f32 to vector<16x1xf32>
    %100 = arith.divf %98, %99 : vector<16x1xf32>
    %101 = vector.broadcast %100 : vector<16x1xf32> to vector<16x32xf32>
    %102 = arith.subf %92, %101 : vector<16x32xf32>
    %103 = vector.broadcast %100 : vector<16x1xf32> to vector<16x32xf32>
    %104 = arith.subf %92, %103 : vector<16x32xf32>
    %105 = arith.mulf %102, %104 : vector<16x32xf32>
    %cst_25 = arith.constant dense<0.000000e+00> : vector<16xf32>
    %106 = vector.multi_reduction <add>, %105, %cst_25 [1] : vector<16x32xf32> to vector<16xf32>
    %107 = vector.shape_cast %106 : vector<16xf32> to vector<16x1xf32>
    %cst_26 = arith.constant 3.200000e+01 : f32
    %108 = vector.broadcast %cst_26 : f32 to vector<16x1xf32>
    %109 = arith.divf %107, %108 : vector<16x1xf32>
    %110 = vector.broadcast %100 : vector<16x1xf32> to vector<16x32xf32>
    %111 = arith.subf %92, %110 : vector<16x32xf32>
    %cst_27 = arith.constant 9.99999974E-6 : f32
    %112 = vector.broadcast %cst_27 : f32 to vector<16x1xf32>
    %113 = arith.addf %109, %112 : vector<16x1xf32>
    %114 = math.rsqrt %113 : vector<16x1xf32>
    %115 = vector.broadcast %114 : vector<16x1xf32> to vector<16x32xf32>
    %116 = arith.mulf %111, %115 : vector<16x32xf32>
    %117 = vector.shape_cast %94 : vector<32xf32> to vector<1x32xf32>
    %118 = vector.broadcast %117 : vector<1x32xf32> to vector<16x32xf32>
    %119 = arith.mulf %116, %118 : vector<16x32xf32>
    %120 = vector.shape_cast %96 : vector<32xf32> to vector<1x32xf32>
    %121 = vector.broadcast %120 : vector<1x32xf32> to vector<16x32xf32>
    %122 = arith.addf %119, %121 : vector<16x32xf32>
    %123 = arith.truncf %122 : vector<16x32xf32> to vector<16x32xbf16>
    %c0_28 = arith.constant 0 : index
    %c0_29 = arith.constant 0 : index
    %124 = vector.load %arg7[%c0_28, %c0_29] : memref<32x128xbf16, #tpu.memory_space<vmem>>, vector<32x128xbf16>
    %cst_30 = arith.constant dense<0.000000e+00> : vector<16x128xf32>
    %125 = tpu.matmul %123, %124, %cst_30 {dimension_numbers = #tpu.dot_dimension_numbers<[1], [0], [0], [1], [0, 0, 1, 1], [], []>} : vector<16x32xbf16>, vector<32x128xbf16>, vector<16x128xf32> -> vector<16x128xf32>
    %c0_31 = arith.constant 0 : index
    %c0_32 = arith.constant 0 : index
    %126 = vector.load %arg8[%c0_31, %c0_32] : memref<1x128xf32, #tpu.memory_space<vmem>>, vector<1x128xf32>
    %127 = vector.shape_cast %126 : vector<1x128xf32> to vector<128xf32>
    %128 = vector.shape_cast %127 : vector<128xf32> to vector<1x128xf32>
    %129 = vector.broadcast %128 : vector<1x128xf32> to vector<16x128xf32>
    %130 = arith.addf %125, %129 : vector<16x128xf32>
    %cst_33 = arith.constant 5.000000e-01 : f32
    %131 = vector.broadcast %cst_33 : f32 to vector<16x128xf32>
    %132 = arith.mulf %131, %130 : vector<16x128xf32>
    %cst_34 = arith.constant 0.707106769 : f32
    %133 = vector.broadcast %cst_34 : f32 to vector<16x128xf32>
    %134 = arith.mulf %130, %133 : vector<16x128xf32>
    %135 = math.erf %134 : vector<16x128xf32>
    %cst_35 = arith.constant 1.000000e+00 : f32
    %136 = vector.broadcast %cst_35 : f32 to vector<16x128xf32>
    %137 = arith.addf %136, %135 : vector<16x128xf32>
    %138 = arith.mulf %132, %137 : vector<16x128xf32>
    %139 = arith.truncf %138 : vector<16x128xf32> to vector<16x128xbf16>
    %c0_36 = arith.constant 0 : index
    %c0_37 = arith.constant 0 : index
    %140 = vector.load %arg9[%c0_36, %c0_37] : memref<128x32xbf16, #tpu.memory_space<vmem>>, vector<128x32xbf16>
    %cst_38 = arith.constant dense<0.000000e+00> : vector<16x32xf32>
    %141 = tpu.matmul %139, %140, %cst_38 {dimension_numbers = #tpu.dot_dimension_numbers<[1], [0], [0], [1], [0, 0, 1, 1], [], []>} : vector<16x128xbf16>, vector<128x32xbf16>, vector<16x32xf32> -> vector<16x32xf32>
    %c0_39 = arith.constant 0 : index
    %c0_40 = arith.constant 0 : index
    %142 = vector.load %arg10[%c0_39, %c0_40] : memref<1x32xf32, #tpu.memory_space<vmem>>, vector<1x32xf32>
    %143 = vector.shape_cast %142 : vector<1x32xf32> to vector<32xf32>
    %144 = vector.shape_cast %143 : vector<32xf32> to vector<1x32xf32>
    %145 = vector.broadcast %144 : vector<1x32xf32> to vector<16x32xf32>
    %146 = arith.addf %141, %145 : vector<16x32xf32>
    %147 = arith.addf %92, %146 : vector<16x32xf32>
    %c0_41 = arith.constant 0 : index
    %c0_42 = arith.constant 0 : index
    %148 = vector.load %arg11[%c0_41, %c0_42] : memref<16x32xf32, #tpu.memory_space<vmem>>, vector<16x32xf32>
    tpu.vector_store %arg11[%c0_41, %c0_42], %147 {strides = array<i32>} : memref<16x32xf32, #tpu.memory_space<vmem>>, vector<16x32xf32>,
    return
  }
}

</mosaic_0001>

<bundles_post_ra>
// kernel: tpu_custom_call.1
= control target key start
LH: loop header
LB: loop body
LE: loop exit
PB: predicated region body
PF: predicated region fallthrough
CT: control target
= control target key end

     0   :  { %vm44_vm0 = vcmask 261120   ;;  %s2131_s0 = inlined_call_operand.vmem [shape: f32[16,32], index: 0, kind: input, shape index: {}]   ;;  %s2132_s1 = inlined_call_operand.vmem [shape: f32[1,32], index: 1, kind: input, shape index: {}]   ;;  %s2133_s2 = inlined_call_operand.vmem [shape: f32[1,32], index: 2, kind: input, shape index: {}]   ;;  %s2134_s3 = inlined_call_operand.vmem [shape: bf16[32,96], index: 3, kind: input, shape index: {}]   ;;  %s2135_s4 = inlined_call_operand.vmem [shape: bf16[32,32], index: 4, kind: input, shape index: {}]   ;;  %s2136_s5 = inlined_call_operand.vmem [shape: f32[1,32], index: 5, kind: input, shape index: {}]   ;;  %s2137_s6 = inlined_call_operand.vmem [shape: f32[1,32], index: 6, kind: input, shape index: {}]   ;;  %s2138_s7 = inlined_call_operand.vmem [shape: bf16[32,128], index: 7, kind: input, shape index: {}]   ;;  %s2139_s8 = inlined_call_operand.vmem [shape: f32[1,128], index: 8, kind: input, shape index: {}]   ;;  %s2140_s9 = inlined_call_operand.vmem [shape: bf16[128,32], index: 9, kind: input, shape index: {}]   ;;  %s2141_s10 = inlined_call_operand.vmem [shape: f32[1,32], index: 10, kind: input, shape index: {}]   ;;  %s2142_s11 = inlined_call_operand.hbm [shape: f32[16,32], index: 11, kind: output, shape index: {}]  }
   0x1   :  { %v1810_v0 = vld [vmem:[%s2131_s0] sm:$0xff]  ;;  %v1815_v1 = vld [vmem:[%s2131_s0 + $0x8] sm:$0xff] }
   0x2   :  { %v45_v2 = vsel %vm44_vm0, %v1810_v0, 0.0  ;;  %v48_v3 = vsel %vm44_vm0, %v1815_v1, 0.0 }
   0x3   :  { %46 = vadd.xlane.f32.xlu0 %v45_v2 }
   0x7   :  { %49 = vadd.xlane.f32.xlu0 %v48_v3 }
   0x8   :  { %16 = vsyncpa [#allocation3], 0  ;;  %v1655_v14 = vld [vmem:[%s2134_s3 + $0x8] sm:$0xff]   ;;  %v1735_v15 = vmov 0.0   ;;  %vm1736_vm1 = vmmov 0   ;;  %v1656_v16 = vld [vmem:[%s2134_s3] sm:$0xff]  }
   0x9   :  { %1488 = vmatprep.subr.bf16.mxu0 %v1735_v15  ;;  %1492 = vmatprep.mubr.msk.bf16.mxu0 %vm1736_vm1, %v1735_v15  ;;  %v1399_v25 = vld [vmem:[%s2132_s1] ss:$0 sm:$0xff]  ;;  %s1737_s27 = smov 80   ;;  %s1738_s1 = smov 104   ;;  %vm180_vm2 = vcmask 64512   ;;  %vm671_vm3 = vcmask 1043456  }
   0xa   :  { %1489 = vmatpush3.bf16.msra.mxu0 %v1655_v14  ;;  %1508 = vmatprep.subr.bf16.mxu1 %v1735_v15  ;;  %v1400_v29 = vld [vmem:[%s2133_s2] ss:$0 sm:$0xff]  ;;  %s1739_s28 = smov 56   ;;  %s1740_s2 = smov 120   ;;  %vm1064_vm4 = vcmask 130048   ;;  %vm1066_vm5 = vcmask 195584  }
   0xb   :  { %1490 = vmatprep.subr.bf16.mxu0 %v1735_v15  ;;  %1510 = vmatprep.mubr.msk.bf16.mxu1 %vm1736_vm1, %v1735_v15  ;;  %s1741_s29 = smov 112   ;;  %s1742_s13 = smov 16  }
   0xc   :  { %s1743_s14 = smov 8   ;;  %s1744_s17 = smov 24  }
   0xe   :  { %1491 = vmatpush3.bf16.msra.mxu0 %v1656_v16 }
   0xf   :  { %1496 = vmatprep.subr.bf16.mxu0 %v1735_v15 }
  0x8c   :  { %v47_v4 = vpop.xlane.xlu0 %46 }
  0x8d   :  { %v52_v5 = vmul.f32 0.03125, %v47_v4 }
  0x8f   :  { %v54_v6 = vsub.f32 %v1810_v0, %v52_v5 }
  0x90   :  { %v50_v7 = vpop.xlane.xlu0 %49 }
  0x91   :  { %v53_v8 = vmul.f32 0.03125, %v50_v7  ;;  %v56_v9 = vmul.f32 %v54_v6, %v54_v6 }
  0x93   :  { %v55_v10 = vsub.f32 %v1815_v1, %v53_v8  ;;  %v58_v11 = vsel %vm44_vm0, %v56_v9, 0.0 }
  0x94   :  { %59 = vadd.xlane.f32.xlu1 %v58_v11 }
  0x95   :  { %v57_v12 = vmul.f32 %v55_v10, %v55_v10 }
  0x97   :  { %v61_v13 = vsel %vm44_vm0, %v57_v12, 0.0 }
  0x98   :  { %62 = vadd.xlane.f32.xlu1 %v61_v13 }
 0x11d   :  { %v60_v17 = vpop.xlane.xlu1 %59 }
 0x11e   :  { %v64_v18 = vmul.f32 0.03125, %v60_v17 }
 0x120   :  { %v66_v19 = vadd.f32 1e-05, %v64_v18 }
 0x121   :  { %v63_v20 = vpop.xlane.xlu1 %62 }
 0x122   :  { %1669 = vrsqrt.f32 %v66_v19  ;;  %v65_v21 = vmul.f32 0.03125, %v63_v20 }
 0x124   :  { %v67_v22 = vadd.f32 1e-05, %v65_v21 }
 0x126   :  { %1671 = vrsqrt.f32 %v67_v22 }
 0x12f   :  { %v1670_v23 = vpop.eup %1669 }
 0x130   :  { %v70_v24 = vmul.f32 %v1670_v23, %v54_v6 }
 0x132   :  { %v78_v28 = vmul.f32 %v1399_v25, %v70_v24 }
 0x133   :  { %v1672_v26 = vpop.eup %1671 }
 0x134   :  { %v71_v27 = vmul.f32 %v1672_v26, %v55_v10  ;;  %v86_v31 = vadd.f32 %v1400_v29, %v78_v28 }
 0x136   :  { %v79_v30 = vmul.f32 %v1399_v25, %v71_v27 }
 0x138   :  { %v87_v32 = vadd.f32 %v1400_v29, %v79_v30 }
 0x13a   :  { %v88_v33 = vpack.c.bf16 %v87_v32, %v86_v31 }
 0x13c   :  { %1493 = vmatmul.mubr.msk.bf16.vlgmr.msra.gmra.mxu0 %vm44_vm0, %v88_v33 }
 0x13d   :  { %1498 = vmatprep.mubr.msk.bf16.mxu0 %vm1736_vm1, %v1735_v15 }
 0x1fc   :  { %v142_v34 = vpop.f32.mrf.mxu0 }
 0x1fd   :  { %153 = vrot.lane.b32.xlu1 %v142_v34, %s1737_s27  ;;  %150 = vrot.lane.b32.xlu0 %v142_v34, %s1738_s1  ;;  %v1848_v38 = vpack.c.bf16 %v142_v34, %v142_v34 }
 0x1fe   :  { %v1494_v35 = vpop.f32.mrf.mxu0 }
 0x200   :  { %v145_v36 = vpop.f32.mrf.mxu0 }
 0x201   :  { %156 = vrot.lane.b32.xlu1 %v142_v34, %s1739_s28  ;;  %163 = vrot.lane.b32.xlu0 %v145_v36, %s1737_s27  ;;  %v1859_v46 = vpack.c.bf16 %v145_v36, %v145_v36 }
 0x202   :  { %v1495_v37 = vpop.f32.mrf.mxu0 }
 0x205   :  { %178 = vrot.lane.b32.xlu0 %v1848_v38, %s1740_s2  ;;  %160 = vrot.lane.b32.xlu1 %v145_v36, %s1738_s1 }
 0x209   :  { %166 = vrot.lane.b32.xlu1 %v145_v36, %s1739_s28 }
 0x26f   :  { %v154_v39 = vpop.permute.xlu1 %153  ;;  %v151_v40 = vpop.permute.xlu0 %150 }
 0x270   :  { %v1851_v41 = vpack.c.bf16 %v154_v39, %v154_v39  ;;  %v1853_v42 = vpack.c.bf16 %v151_v40, %v151_v40 }
 0x272   :  { %277 = vrot.lane.b32.xlu0 %v1851_v41, %s1740_s2  ;;  %228 = vrot.lane.b32.xlu1 %v1853_v42, %s1740_s2 }
 0x273   :  { %v157_v43 = vpop.permute.xlu1 %156  ;;  %v164_v44 = vpop.permute.xlu0 %163 }
 0x274   :  { %v1857_v45 = vpack.c.bf16 %v157_v43, %v157_v43  ;;  %v1863_v49 = vpack.c.bf16 %v164_v44, %v164_v44 }
 0x276   :  { %326 = vrot.lane.b32.xlu1 %v1857_v45, %s1740_s2  ;;  %375 = vrot.lane.b32.xlu0 %v1859_v46, %s1740_s2 }
 0x277   :  { %v179_v47 = vpop.permute.xlu0 %178  ;;  %v161_v48 = vpop.permute.xlu1 %160 }
 0x278   :  { %v185_v50 = vsel %vm180_vm2, %v179_v47, 0  ;;  %v1866_v51 = vpack.c.bf16 %v161_v48, %v161_v48 }
 0x279   :  { %1497 = vmatpush3.bf16.xpose.msra.mxu0 %v185_v50 }
 0x27a   :  { %424 = vrot.lane.b32.xlu1 %v1866_v51, %s1740_s2  ;;  %473 = vrot.lane.b32.xlu0 %v1863_v49, %s1740_s2 }
 0x27b   :  { %v167_v52 = vpop.permute.xlu1 %166  ;;  %1502 = vmatprep.subr.bf16.mxu0 %v1735_v15 }
 0x27c   :  { %v1871_v53 = vpack.c.bf16 %v167_v52, %v167_v52 }
 0x27e   :  { %522 = vrot.lane.b32.xlu1 %v1871_v53, %s1740_s2 }
 0x280   :  { %1499 = vmatmul.mubr.msk.bf16.vlgmr.msra.gmra.mxu0 %vm180_vm2, %v1848_v38 }
 0x281   :  { %1504 = vmatprep.mubr.msk.bf16.mxu0 %vm1736_vm1, %v1735_v15 }
 0x2e4   :  { %v278_v54 = vpop.permute.xlu0 %277  ;;  %v229_v55 = vpop.permute.xlu1 %228 }
 0x2e5   :  { %v234_v56 = vsel %vm180_vm2, %v229_v55, 0  ;;  %v283_v57 = vsel %vm180_vm2, %v278_v54, 0 }
 0x2e6   :  { %1503 = vmatpush3.bf16.xpose.msra.mxu0 %v234_v56  ;;  %1509 = vmatpush3.bf16.xpose.msra.mxu1 %v283_v57 }
 0x2e7   :  { %1514 = vmatprep.subr.bf16.mxu0 %v1735_v15  ;;  %1520 = vmatprep.subr.bf16.mxu1 %v1735_v15 }
 0x2e8   :  { %v327_v58 = vpop.permute.xlu1 %326  ;;  %v376_v59 = vpop.permute.xlu0 %375 }
 0x2e9   :  { %v332_v60 = vsel %vm180_vm2, %v327_v58, 0  ;;  %v381_v61 = vsel %vm180_vm2, %v376_v59, 0 }
 0x2ec   :  { %v425_v62 = vpop.permute.xlu1 %424  ;;  %v474_v63 = vpop.permute.xlu0 %473 }
 0x2ed   :  { %1505 = vmatmul.mubr.msk.bf16.vlgmr.msra.gmra.mxu0 %vm180_vm2, %v1853_v42  ;;  %1511 = vmatmul.mubr.msk.bf16.vlgmr.msra.gmra.mxu1 %vm180_vm2, %v1851_v41  ;;  %v430_v2 = vsel %vm180_vm2, %v425_v62, 0  ;;  %v479_v3 = vsel %vm180_vm2, %v474_v63, 0 }
 0x2ee   :  { %1515 = vmatpush3.bf16.xpose.msra.mxu0 %v332_v60  ;;  %1521 = vmatpush3.bf16.xpose.msra.mxu1 %v381_v61 }
 0x2ef   :  { %1516 = vmatprep.mubr.msk.bf16.mxu0 %vm1736_vm1, %v1735_v15  ;;  %1522 = vmatprep.mubr.msk.bf16.mxu1 %vm1736_vm1, %v1735_v15 }
 0x2f0   :  { %1526 = vmatprep.subr.bf16.mxu0 %v1735_v15  ;;  %1532 = vmatprep.subr.bf16.mxu1 %v1735_v15  ;;  %v523_v4 = vpop.permute.xlu1 %522 }
 0x2f1   :  { %v528_v5 = vsel %vm180_vm2, %v523_v4, 0 }
 0x2f5   :  { %1517 = vmatmul.mubr.msk.bf16.vlgmr.msra.gmra.mxu0 %vm180_vm2, %v1857_v45  ;;  %1523 = vmatmul.mubr.msk.bf16.vlgmr.msra.gmra.mxu1 %vm180_vm2, %v1859_v46 }
 0x2f6   :  { %1527 = vmatpush3.bf16.xpose.msra.mxu0 %v430_v2  ;;  %1533 = vmatpush3.bf16.xpose.msra.mxu1 %v479_v3 }
 0x2f7   :  { %1528 = vmatprep.mubr.msk.bf16.mxu0 %vm1736_vm1, %v1735_v15  ;;  %1534 = vmatprep.mubr.msk.bf16.mxu1 %vm1736_vm1, %v1735_v15 }
 0x2f8   :  { %1538 = vmatprep.subr.bf16.mxu0 %v1735_v15  ;;  %1544 = vmatprep.subr.bf16.mxu1 %v1735_v15 }
 0x2fd   :  { %1529 = vmatmul.mubr.msk.bf16.vlgmr.msra.gmra.mxu0 %vm180_vm2, %v1866_v51  ;;  %1535 = vmatmul.mubr.msk.bf16.vlgmr.msra.gmra.mxu1 %vm180_vm2, %v1863_v49 }
 0x2fe   :  { %1539 = vmatpush3.bf16.xpose.msra.mxu0 %v528_v5  ;;  %1540 = vmatprep.mubr.msk.bf16.mxu0 %vm1736_vm1, %v1735_v15 }
 0x2ff   :  { %1550 = vmatprep.subr.bf16.mxu0 %v1735_v15  ;;  %1546 = vmatprep.mubr.msk.bf16.mxu1 %vm1736_vm1, %v1735_v15 }
 0x305   :  { %1541 = vmatmul.mubr.msk.bf16.vlgmr.msra.gmra.mxu0 %vm180_vm2, %v1871_v53 }
 0x306   :  { %1552 = vmatprep.mubr.msk.bf16.mxu0 %vm1736_vm1, %v1735_v15 }
 0x340   :  { %v221_v6 = vpop.f32.mrf.mxu0 }
 0x341   :  { %v570_v7 = vsel %vm180_vm2, %v221_v6, -inf }
 0x342   :  { %571 = vmax.xlane.f32.xlu0 %v570_v7  ;;  %v1500_v8 = vpop.f32.mrf.mxu0 }
 0x344   :  { %v224_v9 = vpop.f32.mrf.mxu0 }
 0x346   :  { %v1501_v10 = vpop.f32.mrf.mxu0 }
 0x3ad   :  { %v270_v11 = vpop.f32.mrf.mxu0  ;;  %v319_v12 = vpop.f32.mrf.mxu1 }
 0x3ae   :  { %v576_v13 = vsel %vm180_vm2, %v319_v12, -inf  ;;  %v573_v14 = vsel %vm180_vm2, %v270_v11, -inf }
 0x3af   :  { %v1512_v16 = vpop.f32.mrf.mxu1  ;;  %577 = vmax.xlane.f32.xlu0 %v576_v13  ;;  %574 = vmax.xlane.f32.xlu1 %v573_v14  ;;  %v1506_v17 = vpop.f32.mrf.mxu0 }
 0x3b1   :  { %v273_v18 = vpop.f32.mrf.mxu0  ;;  %v322_v19 = vpop.f32.mrf.mxu1 }
 0x3b3   :  { %v1507_v20 = vpop.f32.mrf.mxu0  ;;  %v1513_v21 = vpop.f32.mrf.mxu1 }
 0x3b5   :  { %v1923_v22 = vpop.f32.mrf.mxu0  ;;  %v1925_v23 = vpop.f32.mrf.mxu1 }
 0x3b6   :  { %v579_v24 = vsel %vm180_vm2, %v1923_v22, -inf  ;;  %v582_v29 = vsel %vm180_vm2, %v1925_v23, -inf }
 0x3b7   :  { %v1524_v25 = vpop.f32.mrf.mxu1  ;;  %580 = vmax.xlane.f32.xlu0 %v579_v24  ;;  %v1518_v26 = vpop.f32.mrf.mxu0 }
 0x3b9   :  { %v371_v27 = vpop.f32.mrf.mxu0  ;;  %v420_v28 = vpop.f32.mrf.mxu1 }
 0x3bb   :  { %v1525_v30 = vpop.f32.mrf.mxu1  ;;  %583 = vmax.xlane.f32.xlu0 %v582_v29  ;;  %v1519_v31 = vpop.f32.mrf.mxu0 }
 0x3bd   :  { %v1931_v32 = vpop.f32.mrf.mxu0  ;;  %v1933_v33 = vpop.f32.mrf.mxu1 }
 0x3be   :  { %v588_v34 = vsel %vm180_vm2, %v1933_v33, -inf  ;;  %v585_v35 = vsel %vm180_vm2, %v1931_v32, -inf }
 0x3bf   :  { %v1536_v36 = vpop.f32.mrf.mxu1  ;;  %589 = vmax.xlane.f32.xlu0 %v588_v34  ;;  %586 = vmax.xlane.f32.xlu1 %v585_v35  ;;  %v1530_v37 = vpop.f32.mrf.mxu0 }
 0x3c1   :  { %v469_v39 = vpop.f32.mrf.mxu0  ;;  %v518_v40 = vpop.f32.mrf.mxu1 }
 0x3c3   :  { %v1531_v43 = vpop.f32.mrf.mxu0  ;;  %v1537_v44 = vpop.f32.mrf.mxu1 }
 0x3c5   :  { %v1939_v47 = vpop.f32.mrf.mxu0 }
 0x3c6   :  { %v591_v59 = vsel %vm180_vm2, %v1939_v47, -inf }
 0x3c7   :  { %v1542_v48 = vpop.f32.mrf.mxu0 }
 0x3c9   :  { %v567_v50 = vpop.f32.mrf.mxu0 }
 0x3cb   :  { %v1543_v52 = vpop.f32.mrf.mxu0  ;;  %v572_v54 = vpop.xlane.xlu0 %571 }
 0x3cc   :  { %v594_v55 = vsub.f32 %v221_v6, %v572_v54 }
 0x3ce   :  { %v602_v56 = vmul.f32 1.442695, %v594_v55 }
 0x3d0   :  { %715 = vrot.lane.b32.xlu1 %v1853_v42, %s1741_s29  ;;  %1673 = vpow2.f32 %v602_v56 }
 0x3d4   :  { %763 = vrot.lane.b32.xlu1 %v1851_v41, %s1741_s29 }
 0x3d5   :  { %666 = vrot.lane.b32.xlu0 %v1848_v38, %s1741_s29 }
 0x3dd   :  { %v1947_v57 = vpop.eup %1673 }
 0x3de   :  { %v618_v58 = vsel %vm180_vm2, %v1947_v57, 0.0 }
 0x3f4   :  { %619 = vadd.xlane.f32.xlu0 %v618_v58 }
 0x3f8   :  { %592 = vmax.xlane.f32.xlu1 %v591_v59 }
 0x409   :  { %811 = vrot.lane.b32.xlu1 %v1857_v45, %s1741_s29 }
 0x438   :  { %v578_v41 = vpop.xlane.xlu0 %577  ;;  %v575_v42 = vpop.xlane.xlu1 %574 }
 0x439   :  { %v596_v38 = vsub.f32 %v319_v12, %v578_v41  ;;  %v595_v60 = vsub.f32 %v270_v11, %v575_v42 }
 0x43b   :  { %v606_v61 = vmul.f32 1.442695, %v596_v38  ;;  %v604_v62 = vmul.f32 1.442695, %v595_v60 }
 0x43d   :  { %1675 = vpow2.f32 %v606_v61 }
 0x43e   :  { %1677 = vpow2.f32 %v604_v62 }
 0x440   :  { %v581_v63 = vpop.xlane.xlu0 %580 }
 0x441   :  { %v597_v13 = vsub.f32 %v1923_v22, %v581_v63 }
 0x443   :  { %v608_v17 = vmul.f32 1.442695, %v597_v13 }
 0x444   :  { %v584_v2 = vpop.xlane.xlu0 %583 }
 0x445   :  { %v598_v12 = vsub.f32 %v1925_v23, %v584_v2 }
 0x447   :  { %v610_v14 = vmul.f32 1.442695, %v598_v12 }
 0x448   :  { %v590_v3 = vpop.xlane.xlu0 %589  ;;  %v587_v4 = vpop.xlane.xlu1 %586 }
 0x449   :  { %v600_v16 = vsub.f32 %v1933_v33, %v590_v3  ;;  %v599_v18 = vsub.f32 %v1931_v32, %v587_v4  ;;  %1679 = vpow2.f32 %v610_v14 }
 0x44a   :  { %v1955_v5 = vpop.eup %1675  ;;  %1681 = vpow2.f32 %v608_v17 }
 0x44b   :  { %v1957_v6 = vpop.eup %1677  ;;  %v624_v45 = vsel %vm180_vm2, %v1955_v5, 0.0  ;;  %v614_v19 = vmul.f32 1.442695, %v600_v16  ;;  %v612_v20 = vmul.f32 1.442695, %v599_v18 }
 0x44c   :  { %625 = vadd.xlane.f32.xlu0 %v624_v45  ;;  %v667_v7 = vpop.permute.xlu0 %666  ;;  %v716_v8 = vpop.permute.xlu1 %715  ;;  %v621_v9 = vsel %vm180_vm2, %v1957_v6, 0.0 }
 0x44d   :  { %v673_v10 = vsel %vm671_vm3, %v667_v7, 0  ;;  %v721_v11 = vsel %vm671_vm3, %v716_v8, 0  ;;  %622 = vadd.xlane.f32.xlu1 %v621_v9  ;;  %1683 = vpow2.f32 %v614_v19 }
 0x44e   :  { %1545 = vmatpush3.bf16.msra.mxu1 %v673_v10  ;;  %1551 = vmatpush3.bf16.msra.mxu0 %v721_v11  ;;  %1685 = vpow2.f32 %v612_v20 }
 0x44f   :  { %1556 = vmatprep.subr.bf16.mxu1 %v1735_v15  ;;  %1562 = vmatprep.subr.bf16.mxu0 %v1735_v15 }
 0x450   :  { %v764_v21 = vpop.permute.xlu1 %763 }
 0x451   :  { %v769_v35 = vsel %vm671_vm3, %v764_v21, 0 }
 0x45e   :  { %907 = vrot.lane.b32.xlu1 %v1866_v51, %s1741_s29  ;;  %v1975_v51 = vpop.eup %1679 }
 0x45f   :  { %v1977_v24 = vpop.eup %1681  ;;  %v630_v22 = vsel %vm180_vm2, %v1975_v51, 0.0 }
 0x460   :  { %v1981_v23 = vpop.eup %1683  ;;  %v627_v25 = vsel %vm180_vm2, %v1977_v24, 0.0 }
 0x461   :  { %v1985_v27 = vpop.eup %1685  ;;  %v636_v30 = vsel %vm180_vm2, %v1981_v23, 0.0 }
 0x462   :  { %859 = vrot.lane.b32.xlu0 %v1859_v46, %s1741_s29  ;;  %v633_v31 = vsel %vm180_vm2, %v1985_v27, 0.0 }
 0x47d   :  { %v620_v46 = vpop.xlane.xlu0 %619 }
 0x47e   :  { %1687 = vrcp.f32 %v620_v46 }
 0x481   :  { %631 = vadd.xlane.f32.xlu0 %v630_v22  ;;  %v593_v26 = vpop.xlane.xlu1 %592 }
 0x482   :  { %628 = vadd.xlane.f32.xlu1 %v627_v25  ;;  %v601_v28 = vsub.f32 %v1939_v47, %v593_v26 }
 0x484   :  { %v616_v29 = vmul.f32 1.442695, %v601_v28 }
 0x485   :  { %637 = vadd.xlane.f32.xlu0 %v636_v30  ;;  %v812_v39 = vpop.permute.xlu1 %811 }
 0x486   :  { %1689 = vpow2.f32 %v616_v29  ;;  %634 = vadd.xlane.f32.xlu1 %v633_v31  ;;  %v1657_v29 = vld [vmem:[%s2135_s4 + $0x8] sm:$0xff]  }
 0x48b   :  { %v1688_v32 = vpop.eup %1687 }
 0x48c   :  { %v650_v33 = vmul.f32 %v1688_v32, %v1947_v57 }
 0x48e   :  { %v658_v34 = vpack.c.bf16 %v650_v33, %v650_v33 }
 0x490   :  { %1547 = vmatmul.mubr.msk.bf16.vlgmr.msra.gmra.mxu1 %vm180_vm2, %v658_v34 }
 0x491   :  { %1557 = vmatpush3.bf16.msra.mxu1 %v769_v35  ;;  %1558 = vmatprep.mubr.msk.bf16.mxu1 %vm1736_vm1, %v1735_v15 }
 0x492   :  { %1568 = vmatprep.subr.bf16.mxu1 %v1735_v15 }
 0x493   :  { %v1998_v36 = vpop.eup %1689 }
 0x494   :  { %v639_v37 = vsel %vm180_vm2, %v1998_v36, 0.0 }
 0x495   :  { %640 = vadd.xlane.f32.xlu1 %v639_v37 }
 0x49b   :  { %955 = vrot.lane.b32.xlu0 %v1863_v49, %s1741_s29  ;;  %v817_v49 = vsel %vm671_vm3, %v812_v39, 0 }
 0x4a6   :  { %1003 = vrot.lane.b32.xlu1 %v1871_v53, %s1741_s29 }
 0x4d5   :  { %v626_v40 = vpop.xlane.xlu0 %625 }
 0x4d6   :  { %1691 = vrcp.f32 %v626_v40  ;;  %v623_v43 = vpop.xlane.xlu1 %622 }
 0x4d7   :  { %1693 = vrcp.f32 %v623_v43 }
 0x4d9   :  { %v860_v50 = vpop.permute.xlu0 %859 }
 0x4da   :  { %v865_v56 = vsel %vm671_vm3, %v860_v50, 0  ;;  %v908_v53 = vpop.permute.xlu1 %907 }
 0x4e3   :  { %v1692_v44 = vpop.eup %1691 }
 0x4e4   :  { %v1694_v47 = vpop.eup %1693  ;;  %v652_v48 = vmul.f32 %v1692_v44, %v1955_v5 }
 0x4e5   :  { %v651_v52 = vmul.f32 %v1694_v47, %v1957_v6  ;;  %v913_v6 = vsel %vm671_vm3, %v908_v53, 0 }
 0x4e6   :  { %v660_v54 = vpack.c.bf16 %v652_v48, %v652_v48  ;;  %v1658_v48 = vld [vmem:[%s2135_s4] sm:$0xff]   ;;  %s1745_s4 = smov [#allocation2]  }
 0x4e7   :  { %v659_v55 = vpack.c.bf16 %v651_v52, %v651_v52  ;;  %s1388_s18 = sshll.u32 %s1745_s4, 4  ;;  %s1389_s18 = int_to_ptr.vmem [resolvable:$true] %s1388_s18 }
 0x4e8   :  { %1559 = vmatmul.mubr.msk.bf16.vlgmr.msra.gmra.mxu1 %vm180_vm2, %v660_v54  ;;  %s1713_s19 = scalar_lea.vmem %s1389_s18, 256  ;;  %p1718_p1 = scmp.lt.s32.totalorder %s1389_s18, %s1389_s18 }
 0x4e9   :  { %1553 = vmatmul.mubr.msk.bf16.vlgmr.msra.gmra.mxu0 %vm180_vm2, %v659_v55  ;;  %1569 = vmatpush3.bf16.msra.mxu1 %v865_v56  ;;  %p1714_p0 = scmp.ne.s32.totalorder %s1389_s18, %s1713_s19  ;;  %p1719_p2 = scmp.lt.s32.totalorder %s1713_s19, %s1713_s19 }
 0x4ea   :  { %1563 = vmatpush3.bf16.msra.mxu0 %v817_v49  ;;  %1564 = vmatprep.mubr.msk.bf16.mxu0 %vm1736_vm1, %v1735_v15 }
 0x4eb   :  { %1570 = vmatprep.mubr.msk.bf16.mxu1 %vm1736_vm1, %v1735_v15  ;;  %1574 = vmatprep.subr.bf16.mxu0 %v1735_v15  ;;  %p1720_p3 = por %p1719_p2, %p1718_p1 }
 0x4ec   :  { %1580 = vmatprep.subr.bf16.mxu1 %v1735_v15 }
 0x4ed   :  { %p1721_p4 = pnand %p1720_p3, %p1714_p0 }
 0x50a   :  { %v632_v57 = vpop.xlane.xlu0 %631 }
 0x50b   :  { %1695 = vrcp.f32 %v632_v57  ;;  %v629_v58 = vpop.xlane.xlu1 %628 }
 0x50c   :  { %1697 = vrcp.f32 %v629_v58 }
 0x50e   :  { %v638_v59 = vpop.xlane.xlu0 %637 }
 0x50f   :  { %1699 = vrcp.f32 %v638_v59  ;;  %v635_v41 = vpop.xlane.xlu1 %634 }
 0x510   :  { %1701 = vrcp.f32 %v635_v41 }
 0x512   :  { %v956_v61 = vpop.permute.xlu0 %955 }
 0x513   :  { %v961_v5 = vsel %vm671_vm3, %v956_v61, 0 }
 0x518   :  { %v1696_v42 = vpop.eup %1695 }
 0x519   :  { %v1698_v38 = vpop.eup %1697  ;;  %v654_v60 = vmul.f32 %v1696_v42, %v1975_v51 }
 0x51a   :  { %v653_v62 = vmul.f32 %v1698_v38, %v1977_v24 }
 0x51b   :  { %v662_v63 = vpack.c.bf16 %v654_v60, %v654_v60 }
 0x51c   :  { %v1700_v2 = vpop.eup %1699  ;;  %v661_v3 = vpack.c.bf16 %v653_v62, %v653_v62 }
 0x51d   :  { %v1702_v4 = vpop.eup %1701  ;;  %1571 = vmatmul.mubr.msk.bf16.vlgmr.msra.gmra.mxu1 %vm180_vm2, %v662_v63  ;;  %v656_v7 = vmul.f32 %v1700_v2, %v1981_v23 }
 0x51e   :  { %1565 = vmatmul.mubr.msk.bf16.vlgmr.msra.gmra.mxu0 %vm180_vm2, %v661_v3  ;;  %1581 = vmatpush3.bf16.msra.mxu1 %v961_v5  ;;  %v641_v45 = vpop.xlane.xlu1 %640  ;;  %v655_v8 = vmul.f32 %v1702_v4, %v1985_v27 }
 0x51f   :  { %1575 = vmatpush3.bf16.msra.mxu0 %v913_v6  ;;  %1703 = vrcp.f32 %v641_v45  ;;  %1576 = vmatprep.mubr.msk.bf16.mxu0 %vm1736_vm1, %v1735_v15  ;;  %v664_v10 = vpack.c.bf16 %v656_v7, %v656_v7 }
 0x520   :  { %1582 = vmatprep.mubr.msk.bf16.mxu1 %vm1736_vm1, %v1735_v15  ;;  %1586 = vmatprep.subr.bf16.mxu0 %v1735_v15  ;;  %v663_v12 = vpack.c.bf16 %v655_v8, %v655_v8 }
 0x521   :  { %1592 = vmatprep.subr.bf16.mxu1 %v1735_v15 }
 0x522   :  { %v1004_v9 = vpop.permute.xlu1 %1003 }
 0x523   :  { %v1009_v11 = vsel %vm671_vm3, %v1004_v9, 0 }
 0x525   :  { %1583 = vmatmul.mubr.msk.bf16.vlgmr.msra.gmra.mxu1 %vm180_vm2, %v664_v10 }
 0x526   :  { %1577 = vmatmul.mubr.msk.bf16.vlgmr.msra.gmra.mxu0 %vm180_vm2, %v663_v12  ;;  %1596 = vmatprep.mubr.msk.bf16.mxu1 %vm1736_vm1, %v1735_v15 }
 0x527   :  { %1587 = vmatpush3.bf16.msra.mxu0 %v1009_v11  ;;  %1588 = vmatprep.mubr.msk.bf16.mxu0 %vm1736_vm1, %v1735_v15 }
 0x528   :  { %1600 = vmatprep.subr.bf16.mxu0 %v1735_v15  ;;  %1593 = vmatpush3.bf16.msra.mxu1 %v1657_v29 }
 0x529   :  { %1594 = vmatprep.subr.bf16.mxu1 %v1735_v15 }
 0x52c   :  { %v1704_v13 = vpop.eup %1703  ;;  %1595 = vmatpush3.bf16.msra.mxu1 %v1658_v48  ;;  %v1662_v48 = vld [vmem:[%s2140_s9 + $0x30] sm:$0xff]  }
 0x52d   :  { %v657_v14 = vmul.f32 %v1704_v13, %v1998_v36  ;;  %1608 = vmatprep.subr.bf16.mxu1 %v1735_v15 }
 0x52f   :  { %v665_v16 = vpack.c.bf16 %v657_v14, %v657_v14 }
 0x531   :  { %1589 = vmatmul.mubr.msk.bf16.vlgmr.msra.gmra.mxu0 %vm180_vm2, %v665_v16 }
 0x532   :  { %1604 = vmatprep.mubr.msk.bf16.mxu0 %vm1736_vm1, %v1735_v15 }
 0x550   :  { %v709_v17 = vpop.f32.mrf.mxu1 }
 0x552   :  { %v1548_v18 = vpop.f32.mrf.mxu1 }
 0x554   :  { %v712_v19 = vpop.f32.mrf.mxu1 }
 0x556   :  { %v1549_v20 = vpop.f32.mrf.mxu1 }
 0x5a8   :  { %v805_v51 = vpop.f32.mrf.mxu1 }
 0x5a9   :  { %v757_v21 = vpop.f32.mrf.mxu0 }
 0x5aa   :  { %v1560_v46 = vpop.f32.mrf.mxu1 }
 0x5ab   :  { %v1554_v24 = vpop.f32.mrf.mxu0 }
 0x5ac   :  { %v808_v22 = vpop.f32.mrf.mxu1 }
 0x5ad   :  { %v760_v23 = vpop.f32.mrf.mxu0  ;;  %v1659_v22 = vld [vmem:[%s2138_s7 + $0x8] sm:$0xff]  }
 0x5ae   :  { %v1561_v25 = vpop.f32.mrf.mxu1  ;;  %1601 = vmatpush3.bf16.msra.mxu0 %v1659_v22  ;;  %v1660_v23 = vld [vmem:[%s2138_s7] sm:$0xff]  }
 0x5af   :  { %v1555_v26 = vpop.f32.mrf.mxu0  ;;  %1602 = vmatprep.subr.bf16.mxu0 %v1735_v15  ;;  %v1661_v25 = vld [vmem:[%s2140_s9 + $0x38] sm:$0xff]  }
 0x5b2   :  { %1603 = vmatpush3.bf16.msra.mxu0 %v1660_v23 }
 0x5dd   :  { %v901_v27 = vpop.f32.mrf.mxu1 }
 0x5de   :  { %v853_v28 = vpop.f32.mrf.mxu0 }
 0x5df   :  { %v1572_v30 = vpop.f32.mrf.mxu1 }
 0x5e0   :  { %v1566_v31 = vpop.f32.mrf.mxu0 }
 0x5e1   :  { %v904_v32 = vpop.f32.mrf.mxu1 }
 0x5e2   :  { %v856_v33 = vpop.f32.mrf.mxu0 }
 0x5e3   :  { %v1573_v34 = vpop.f32.mrf.mxu1 }
 0x5e4   :  { %v1567_v35 = vpop.f32.mrf.mxu0  ;;  %v1423_v34 = vld [vmem:[%s2136_s5] ss:$0 sm:$0xff] }
 0x5e5   :  { %v997_v36 = vpop.f32.mrf.mxu1 }
 0x5e6   :  { %v949_v37 = vpop.f32.mrf.mxu0  ;;  %v1645_v39 = vpack.i.bf16 %v997_v36, %v805_v51 }
 0x5e7   :  { %v1640_v40 = vpack.i.bf16 %v949_v37, %v757_v21  ;;  %v1584_v43 = vpop.f32.mrf.mxu1 }
 0x5e8   :  { %v1578_v44 = vpop.f32.mrf.mxu0  ;;  %1646 = vrot.lane.b32.xlu1 %v1645_v39, %s1742_s13  ;;  %v1424_v39 = vld [vmem:[%s2137_s6] ss:$0 sm:$0xff] }
 0x5e9   :  { %1641 = vrot.lane.b32.xlu0 %v1640_v40, %s1743_s14  ;;  %v1000_v47 = vpop.f32.mrf.mxu1 }
 0x5ea   :  { %v952_v50 = vpop.f32.mrf.mxu0 }
 0x5eb   :  { %v1585_v52 = vpop.f32.mrf.mxu1  ;;  %v1663_v50 = vld [vmem:[%s2140_s9 + $0x28] sm:$0xff]  }
 0x5ec   :  { %v1579_v54 = vpop.f32.mrf.mxu0  ;;  %v1664_v52 = vld [vmem:[%s2140_s9 + $0x20] sm:$0xff]  }
 0x5ed   :  { %v1665_v54 = vld [vmem:[%s2140_s9 + $0x18] sm:$0xff]  }
 0x5f1   :  { %v1045_v55 = vpop.f32.mrf.mxu0 }
 0x5f2   :  { %v1650_v56 = vpack.i.bf16 %v1045_v55, %v853_v28  ;;  %v1666_v55 = vld [vmem:[%s2140_s9 + $0x10] sm:$0xff]  }
 0x5f3   :  { %v1590_v49 = vpop.f32.mrf.mxu0 }
 0x5f4   :  { %1651 = vrot.lane.b32.xlu0 %v1650_v56, %s1744_s17  ;;  %v1667_v56 = vld [vmem:[%s2140_s9 + $0x8] sm:$0xff]   ;;  %v1668_v49 = vld [vmem:[%s2140_s9] sm:$0xff]  }
 0x5f5   :  { %v1048_v53 = vpop.f32.mrf.mxu0 }
 0x5f6   :  { %v1425_v53 = vld [vmem:[%s2139_s8] ss:$0 sm:$0xff] }
 0x5f7   :  { %v1591_v57 = vpop.f32.mrf.mxu0 }
 0x65a   :  { %v1647_v59 = vpop.permute.xlu1 %1646 }
 0x65b   :  { %v1642_v58 = vpop.permute.xlu0 %1641  ;;  %v1649_v38 = vunpack.i.h.bf16 %v1647_v59  ;;  %v1648_v60 = vunpack.i.l.bf16 %v1647_v59 }
 0x65c   :  { %v1644_v41 = vunpack.i.h.bf16 %v1642_v58  ;;  %v1643_v42 = vunpack.i.l.bf16 %v1642_v58 }
 0x65e   :  { %v1080_v61 = vsel %vm180_vm2, %v901_v27, %v1644_v41  ;;  %v1063_v62 = vsel %vm180_vm2, %v709_v17, %v1643_v42 }
 0x65f   :  { %v1065_v4 = vsel %vm1064_vm4, %v1063_v62, %v1648_v60  ;;  %v1081_v5 = vsel %vm1064_vm4, %v1080_v61, %v1649_v38 }
 0x666   :  { %v1652_v63 = vpop.permute.xlu0 %1651 }
 0x667   :  { %v1654_v2 = vunpack.i.h.bf16 %v1652_v63  ;;  %v1653_v3 = vunpack.i.l.bf16 %v1652_v63 }
 0x669   :  { %v1082_v6 = vsel %vm1066_vm5, %v1081_v5, %v1654_v2  ;;  %v1067_v45 = vsel %vm1066_vm5, %v1065_v4, %v1653_v3 }
 0x66a   :  { %v1083_v7 = vpack.c.bf16 %v1082_v6, %v1067_v45 }
 0x66c   :  { %1597 = vmatmul.mubr.msk.bf16.vlgmr.msra.gmra.mxu1 %vm44_vm0, %v1083_v7  ;;  %v1429_v7 = vld [vmem:[%s2141_s10] ss:$0 sm:$0xff] }
 0x66d   :  { %1624 = vmatprep.mubr.msk.bf16.mxu1 %vm1736_vm1, %v1735_v15  ;;  %1609 = vmatpush3.bf16.msra.mxu1 %v1661_v25 }
 0x66e   :  { %1610 = vmatprep.subr.bf16.mxu1 %v1735_v15 }
 0x671   :  { %1611 = vmatpush3.bf16.msra.mxu1 %v1662_v48 }
 0x672   :  { %1612 = vmatprep.subr.bf16.mxu1 %v1735_v15 }
 0x675   :  { %1613 = vmatpush3.bf16.msra.mxu1 %v1663_v50 }
 0x676   :  { %1614 = vmatprep.subr.bf16.mxu1 %v1735_v15 }
 0x679   :  { %1615 = vmatpush3.bf16.msra.mxu1 %v1664_v52 }
 0x67a   :  { %1616 = vmatprep.subr.bf16.mxu1 %v1735_v15 }
 0x67d   :  { %1617 = vmatpush3.bf16.msra.mxu1 %v1665_v54 }
 0x67e   :  { %1618 = vmatprep.subr.bf16.mxu1 %v1735_v15 }
 0x681   :  { %1619 = vmatpush3.bf16.msra.mxu1 %v1666_v55 }
 0x682   :  { %1620 = vmatprep.subr.bf16.mxu1 %v1735_v15 }
 0x685   :  { %1621 = vmatpush3.bf16.msra.mxu1 %v1667_v56 }
 0x686   :  { %1622 = vmatprep.subr.bf16.mxu1 %v1735_v15 }
 0x689   :  { %1623 = vmatpush3.bf16.msra.mxu1 %v1668_v49 }
 0x72c   :  { %v1137_v8 = vpop.f32.mrf.mxu1 }
 0x72d   :  { %v2059_v9 = vadd.f32 %v1137_v8, %v1810_v0 }
 0x72e   :  { %v1598_v10 = vpop.f32.mrf.mxu1 }
 0x72f   :  { %v1146_v11 = vsel %vm44_vm0, %v2059_v9, 0.0 }
 0x730   :  { %1147 = vadd.xlane.f32.xlu1 %v1146_v11  ;;  %v1140_v12 = vpop.f32.mrf.mxu1 }
 0x731   :  { %v2064_v13 = vadd.f32 %v1140_v12, %v1815_v1 }
 0x732   :  { %v1599_v14 = vpop.f32.mrf.mxu1 }
 0x733   :  { %v1149_v16 = vsel %vm44_vm0, %v2064_v13, 0.0 }
 0x734   :  { %1150 = vadd.xlane.f32.xlu0 %v1149_v16 }
 0x7b9   :  { %v1148_v17 = vpop.xlane.xlu1 %1147 }
 0x7ba   :  { %v1152_v18 = vmul.f32 0.03125, %v1148_v17 }
 0x7bc   :  { %v1154_v19 = vsub.f32 %v2059_v9, %v1152_v18 }
 0x7bd   :  { %v1151_v0 = vpop.xlane.xlu0 %1150 }
 0x7be   :  { %v1153_v20 = vmul.f32 0.03125, %v1151_v0  ;;  %v1156_v51 = vmul.f32 %v1154_v19, %v1154_v19 }
 0x7c0   :  { %v1155_v21 = vsub.f32 %v2064_v13, %v1153_v20  ;;  %v1158_v46 = vsel %vm44_vm0, %v1156_v51, 0.0 }
 0x7c1   :  { %1159 = vadd.xlane.f32.xlu0 %v1158_v46 }
 0x7c2   :  { %v1157_v24 = vmul.f32 %v1155_v21, %v1155_v21 }
 0x7c4   :  { %v1161_v1 = vsel %vm44_vm0, %v1157_v24, 0.0 }
 0x7c5   :  { %1162 = vadd.xlane.f32.xlu0 %v1161_v1 }
 0x84a   :  { %v1160_v26 = vpop.xlane.xlu0 %1159 }
 0x84b   :  { %v1164_v27 = vmul.f32 0.03125, %v1160_v26 }
 0x84d   :  { %v1166_v28 = vadd.f32 1e-05, %v1164_v27 }
 0x84e   :  { %v1163_v29 = vpop.xlane.xlu0 %1162 }
 0x84f   :  { %1705 = vrsqrt.f32 %v1166_v28  ;;  %v1165_v30 = vmul.f32 0.03125, %v1163_v29 }
 0x851   :  { %v1167_v31 = vadd.f32 1e-05, %v1165_v30 }
 0x853   :  { %1707 = vrsqrt.f32 %v1167_v31 }
 0x85c   :  { %v1706_v32 = vpop.eup %1705 }
 0x85d   :  { %v1170_v33 = vmul.f32 %v1706_v32, %v1154_v19 }
 0x85f   :  { %v1178_v37 = vmul.f32 %v1423_v34, %v1170_v33 }
 0x860   :  { %v1708_v35 = vpop.eup %1707 }
 0x861   :  { %v1171_v36 = vmul.f32 %v1708_v35, %v1155_v21  ;;  %v1186_v43 = vadd.f32 %v1424_v39, %v1178_v37 }
 0x863   :  { %v1179_v40 = vmul.f32 %v1423_v34, %v1171_v36 }
 0x865   :  { %v1187_v44 = vadd.f32 %v1424_v39, %v1179_v40 }
 0x867   :  { %v1188_v47 = vpack.c.bf16 %v1187_v44, %v1186_v43 }
 0x869   :  { %1605 = vmatmul.mubr.msk.bf16.vlgmr.msra.gmra.mxu0 %vm44_vm0, %v1188_v47 }
 0x929   :  { %v1249_v57 = vpop.f32.mrf.mxu0 }
 0x92a   :  { %v1250_v58 = vadd.f32 %v1425_v53, %v1249_v57 }
 0x92b   :  { %v1606_v59 = vpop.f32.mrf.mxu0 }
 0x92c   :  { %v1258_v41 = vmul.f32 0.70710677, %v1250_v58  ;;  %v1256_v2 = vmul.f32 0.5, %v1250_v58 }
 0x92d   :  { %v1252_v42 = vpop.f32.mrf.mxu0 }
 0x92e   :  { %1709 = verf.f32 %v1258_v41  ;;  %v1253_v38 = vadd.f32 %v1425_v53, %v1252_v42 }
 0x92f   :  { %v1607_v60 = vpop.f32.mrf.mxu0 }
 0x930   :  { %v1259_v61 = vmul.f32 0.70710677, %v1253_v38  ;;  %v1257_v3 = vmul.f32 0.5, %v1253_v38 }
 0x932   :  { %1711 = verf.f32 %v1259_v61 }
 0x93b   :  { %v1710_v15 = vpop.eup %1709 }
 0x93c   :  { %v1262_v62 = vadd.f32 1.0, %v1710_v15 }
 0x93e   :  { %v1264_v5 = vmul.f32 %v1262_v62, %v1256_v2 }
 0x93f   :  { %v1712_v63 = vpop.eup %1711 }
 0x940   :  { %v1263_v4 = vadd.f32 1.0, %v1712_v63 }
 0x942   :  { %v1265_v6 = vmul.f32 %v1263_v4, %v1257_v3 }
 0x944   :  { %v1266_v45 = vpack.c.bf16 %v1265_v6, %v1264_v5 }
 0x946   :  { %1625 = vmatmul.mubr.bf16.vlgmr.msra.gmra.mxu1 %v1266_v45 }
 0xa06   :  { %v1372_v8 = vpop.f32.mrf.mxu1 }
 0xa07   :  { %v1373_v10 = vadd.f32 %v1429_v7, %v1372_v8 }
 0xa08   :  { %v1626_v11 = vpop.f32.mrf.mxu1 }
 0xa09   :  { %v1379_v12 = vadd.f32 %v1373_v10, %v2059_v9 }
 0xa0a   :  { %v1375_v14 = vpop.f32.mrf.mxu1 }
 0xa0b   :  { %1381 = vst.msk [vmem:[#allocation2] sm:$0xff] %vm44_vm0, %v1379_v12  ;;  %v1376_v16 = vadd.f32 %v1429_v7, %v1375_v14 }
 0xa0c   :  { %v1627_v17 = vpop.f32.mrf.mxu1 }
 0xa0d   :  { %v1380_v18 = vadd.f32 %v1376_v16, %v2064_v13 }
 0xa0f   :  { %1382 = vst.msk [vmem:[#allocation2 + $0x8] sm:$0xff] %vm44_vm0, %v1380_v18 }
 0xa10   :  { %1724 = shalt.err (!%p1721_p4)
}
 0xa11   :  { %s1746_s10 = smov 128  }
 0xa12   :  { %1394 = dma.vmem_to_hbm [thread:$0]  %s1389_s18, 256, %s2142_s11, [#allocation3], %s1746_s10, %s1746_s10, %s1743_s14  }
 0xa13   :  { %1733 = dma.done.wait [#allocation3], 256  }
 0xa14   :  { %1734 = vsyncadd [#allocation3], 4294967040 }
 0xa15   :  { %1398 = vsyncpa [#allocation3], 1 }

</bundles_post_ra>
